<compile_context>
chip_gen: v6e
topology: v6e:2x2x1
jax: 0.10.0
libtpu: 0.0.40
codegen_flags: <defaults>
</compile_context>

<pallas_src>
import functools

import jax
import jax.numpy as jnp
from jax import lax
from jax.experimental import pallas as pl
from jax.experimental.pallas import tpu as pltpu


# --------------------------------------------------------------------------
# helpers
# --------------------------------------------------------------------------
def _layernorm(x, gamma, beta, eps=1e-5):
    mu = jnp.mean(x, axis=-1, keepdims=True)
    var = jnp.mean((x - mu) ** 2, axis=-1, keepdims=True)
    return (x - mu) * lax.rsqrt(var + eps) * gamma + beta


def _const_spec(shape):
    """BlockSpec for a grid-invariant operand (weights / LN params / biases).

    The index_map is constant, so a single VMEM buffer suffices;
    pl.Buffered(1) stops Pallas from double-buffering it.  Falls back to the
    default spec on JAX versions without pipeline_mode.
    """
    index_map = lambda b, n: (0,) * len(shape)
    try:
        return pl.BlockSpec(shape, index_map, pipeline_mode=pl.Buffered(1))
    except (TypeError, AttributeError, ValueError):
        return pl.BlockSpec(shape, index_map)


def _default_vmem_limit_bytes():
    cap = 64 * 1024 * 1024           # conservative: v7x per-TensorCore VMEM
    try:
        cap = int(pltpu.get_tpu_info().vmem_capacity_bytes)
    except Exception:
        pass
    return max(32 * 1024 * 1024, min(int(cap * 0.8), 100 * 1024 * 1024))


def _pick_tile_n(N, max_tile=256):
    if N <= max_tile:
        return N
    for t in range(max_tile, 7, -1):
        if N % t == 0 and t % 8 == 0:
            return t
    return N


# --------------------------------------------------------------------------
# Pass 1: LayerNorm1 + QKV projection  ->  q (pre-scaled), k, v   (bf16)
# --------------------------------------------------------------------------
def qkv_kernel(x_ref, ln1_g_ref, ln1_b_ref, wqkv_ref,
               q_ref, k_ref, v_ref, *, dim, num_heads):
    scale = (dim // num_heads) ** (-0.5)
    x = x_ref[0].astype(jnp.float32)                               # (Tn, C)
    xn = _layernorm(x, ln1_g_ref[...], ln1_b_ref[...]).astype(jnp.bfloat16)
    qkv = jnp.dot(xn, wqkv_ref[...],
                  preferred_element_type=jnp.float32)              # (Tn, 3C)
    q_ref[0] = (qkv[:, 0:dim] * scale).astype(jnp.bfloat16)
    k_ref[0] = qkv[:, dim:2 * dim].astype(jnp.bfloat16)
    v_ref[0] = qkv[:, 2 * dim:3 * dim].astype(jnp.bfloat16)


# --------------------------------------------------------------------------
# Pass 2: attention + output proj + residual + LayerNorm2 + MLP + residual
# --------------------------------------------------------------------------
def block_kernel(x_ref, q_ref, k_ref, v_ref,
                 wproj_ref, bproj_ref, ln2_g_ref, ln2_b_ref,
                 w1_ref, b1_ref, w2_ref, b2_ref,
                 o_ref, attn_scr, *, num_heads, dim):
    head_dim = dim // num_heads

    # Lane-dense head groups: head outputs are concatenated so every store to
    # attn_scr spans >= 128 lanes (or full C) -> unmasked full-vreg stores.
    if head_dim >= 128:
        hpg = 1
    else:
        hpg = min(num_heads, max(1, 128 // head_dim))
        while num_heads % hpg:
            hpg -= 1
    group_width = hpg * head_dim
    num_groups = num_heads // hpg

    xt = x_ref[0].astype(jnp.float32)        # (Tn, C) residual input
    q = q_ref[0]                             # (Tn, C) bf16, scale already folded

    for g in range(num_groups):
        base = g * group_width
        outs = []
        for j in range(hpg):
            lo = base + j * head_dim
            hi = lo + head_dim
            qh = q[:, lo:hi]                                       # (Tn, D) bf16
            kh = k_ref[0, :, lo:hi]                                # (N, D)  bf16
            vh = v_ref[0, :, lo:hi]                                # (N, D)  bf16
            # q @ k^T directly via dot_general (no materialized transpose)
            s = lax.dot_general(qh, kh, (((1,), (1,)), ((), ())),
                                preferred_element_type=jnp.float32)  # (Tn, N)
            s = s - jnp.max(s, axis=-1, keepdims=True)
            p = jnp.exp(s)
            p = p * pl.reciprocal(jnp.sum(p, axis=-1, keepdims=True), approx=True)
            oh = jnp.dot(p.astype(jnp.bfloat16), vh,
                         preferred_element_type=jnp.float32)         # (Tn, D)
            outs.append(oh.astype(jnp.bfloat16))
        grp = outs[0] if hpg == 1 else jnp.concatenate(outs, axis=1)
        attn_scr[:, base:base + group_width] = grp

    # ---- output projection + residual ----
    proj = jnp.dot(attn_scr[...], wproj_ref[...],
                   preferred_element_type=jnp.float32) + bproj_ref[...]
    x1 = xt + proj                                                   # (Tn, C) f32

    # ---- LayerNorm 2 + MLP (fc1 -> erf GELU -> fc2) + residual ----
    x2n = _layernorm(x1, ln2_g_ref[...], ln2_b_ref[...]).astype(jnp.bfloat16)
    h1 = jnp.dot(x2n, w1_ref[...], preferred_element_type=jnp.float32) + b1_ref[...]
    h1 = jax.nn.gelu(h1, approximate=False).astype(jnp.bfloat16)     # nn.GELU default
    h2 = jnp.dot(h1, w2_ref[...], preferred_element_type=jnp.float32) + b2_ref[...]
    o_ref[0] = (x1 + h2).astype(o_ref.dtype)


# --------------------------------------------------------------------------
# wrapper
# --------------------------------------------------------------------------
def vit_block_forward(x, params, *, num_heads, tile_n=None, vmem_limit_bytes=None):
    B, N, C = x.shape
    Hm = params["w1"].shape[1]
    assert C % num_heads == 0

    if vmem_limit_bytes is None:
        vmem_limit_bytes = _default_vmem_limit_bytes()
    if tile_n is None:
        # bigger tiles on 128 MiB-class parts (v5e/v6e), conservative on v7x
        max_tile = 512 if vmem_limit_bytes >= 96 * 1024 * 1024 else 256
        tile_n = _pick_tile_n(N, max_tile)
    assert N % tile_n == 0, "tile_n must divide N"
    if tile_n < N:
        assert tile_n % 8 == 0, "a tiled tile_n must be a multiple of 8"
    n_tiles = N // tile_n

    tile_spec = pl.BlockSpec((1, tile_n, C), lambda b, n: (b, n, 0))
    seq_spec = pl.BlockSpec((1, N, C), lambda b, n: (b, 0, 0))

    # ---------------- pass 1: LN1 + QKV projection ----------------
    qkv_call = pl.pallas_call(
        functools.partial(qkv_kernel, dim=C, num_heads=num_heads),
        out_shape=(jax.ShapeDtypeStruct((B, N, C), jnp.bfloat16),) * 3,
        grid=(B, n_tiles),
        in_specs=[
            tile_spec,                 # x tile
            _const_spec((1, C)),       # ln1 gamma
            _const_spec((1, C)),       # ln1 beta
            _const_spec((C, 3 * C)),   # Wqkv^T (bf16)
        ],
        out_specs=(tile_spec,) * 3,
        compiler_params=pltpu.CompilerParams(
            dimension_semantics=("parallel", "parallel"),
            vmem_limit_bytes=vmem_limit_bytes,
        ),
        cost_estimate=pl.CostEstimate(
            flops=6 * B * N * C * C,
            transcendentals=B * N,
            bytes_accessed=B * N * C * 4 + 3 * B * N * C * 2 + 6 * C * C + 16 * C,
        ),
    )
    q, k, v = qkv_call(x, params["ln1_g"], params["ln1_b"], params["wqkv"])

    # ---------------- pass 2: attention + MLP ----------------
    flops = B * N * (4 * N * C + 2 * C * C + 4 * C * Hm)
    transcendentals = B * N * (num_heads * N + Hm)      # softmax exp + GELU erf
    bytes_accessed = (2 * B * N * C * 4                 # x in + out (f32)
                      + 3 * B * N * C * 2               # q/k/v (bf16)
                      + 2 * (C * C + 2 * C * Hm)        # bf16 weights
                      + 4 * (4 * C + Hm))               # biases / LN params

    block_call = pl.pallas_call(
        functools.partial(block_kernel, num_heads=num_heads, dim=C),
        out_shape=jax.ShapeDtypeStruct((B, N, C), x.dtype),
        grid=(B, n_tiles),
        in_specs=[
            tile_spec,                 # x (residual) tile
            tile_spec,                 # q tile (bf16, pre-scaled)
            seq_spec,                  # k full sequence (bf16)
            seq_spec,                  # v full sequence (bf16)
            _const_spec((C, C)),       # Wproj^T (bf16)
            _const_spec((1, C)),       # proj bias
            _const_spec((1, C)),       # ln2 gamma
            _const_spec((1, C)),       # ln2 beta
            _const_spec((C, Hm)),      # W1^T (bf16)
            _const_spec((1, Hm)),      # b1
            _const_spec((Hm, C)),      # W2^T (bf16)
            _const_spec((1, C)),       # b2
        ],
        out_specs=tile_spec,
        scratch_shapes=[pltpu.VMEM((tile_n, C), jnp.bfloat16)],   # head outputs
        compiler_params=pltpu.CompilerParams(
            dimension_semantics=("parallel", "parallel"),
            vmem_limit_bytes=vmem_limit_bytes,
        ),
        cost_estimate=pl.CostEstimate(
            flops=flops, transcendentals=transcendentals,
            bytes_accessed=bytes_accessed),
    )
    return block_call(x, q, k, v,
                      params["wproj"], params["bproj"],
                      params["ln2_g"], params["ln2_b"],
                      params["w1"], params["b1"], params["w2"], params["b2"])


# --------------------------------------------------------------------------
# parameters & pure-JAX reference
# --------------------------------------------------------------------------
def init_params(key, dim, num_heads, mlp_ratio=4.0):
    Hm = int(dim * mlp_ratio)
    ks = jax.random.split(key, 5)
    std = 0.02
    f32, bf16 = jnp.float32, jnp.bfloat16
    return {
        "ln1_g": jnp.ones((1, dim), f32),
        "ln1_b": jnp.zeros((1, dim), f32),
        # matmul weights stored pre-transposed (kernel does x @ W) and in bf16
        # (intentional: bf16 MXU peak, half HBM/VMEM; f32 accumulation).
        "wqkv":  (std * jax.random.normal(ks[0], (dim, 3 * dim), f32)).astype(bf16),
        "wproj": (std * jax.random.normal(ks[1], (dim, dim), f32)).astype(bf16),
        "bproj": std * jax.random.normal(ks[2], (1, dim), f32),
        "ln2_g": jnp.ones((1, dim), f32),
        "ln2_b": jnp.zeros((1, dim), f32),
        "w1":    (std * jax.random.normal(ks[3], (dim, Hm), f32)).astype(bf16),
        "b1":    jnp.zeros((1, Hm), f32),
        "w2":    (std * jax.random.normal(ks[4], (Hm, dim), f32)).astype(bf16),
        "b2":    jnp.zeros((1, dim), f32),
    }


def reference_block(x, p, num_heads):
    """Pure-JAX f32 reference mirroring the PyTorch forward (eval mode)."""
    B, N, C = x.shape
    D = C // num_heads
    eps = 1e-5
    f32 = lambda a: a.astype(jnp.float32)

    def ln(z, g, b):
        mu = jnp.mean(z, -1, keepdims=True)
        var = jnp.mean((z - mu) ** 2, -1, keepdims=True)
        return (z - mu) / jnp.sqrt(var + eps) * g + b

    xn = ln(x, p["ln1_g"][0], p["ln1_b"][0])
    qkv = xn @ f32(p["wqkv"])                               # (B, N, 3C)
    qkv = qkv.reshape(B, N, 3, num_heads, D).transpose(2, 0, 3, 1, 4)
    q, k, v = qkv[0], qkv[1], qkv[2]                        # (B, H, N, D)
    attn = jnp.einsum("bhnd,bhmd->bhnm", q, k) * D ** (-0.5)
    attn = jax.nn.softmax(attn, axis=-1)
    o = jnp.einsum("bhnm,bhmd->bhnd", attn, v)
    o = o.transpose(0, 2, 1, 3).reshape(B, N, C)
    x1 = x + (o @ f32(p["wproj"]) + p["bproj"][0])
    x2n = ln(x1, p["ln2_g"][0], p["ln2_b"][0])
    h = jax.nn.gelu(x2n @ f32(p["w1"]) + p["b1"][0], approximate=False)
    return x1 + (h @ f32(p["w2"]) + p["b2"][0])


if __name__ == "__main__":
    key = jax.random.PRNGKey(0)
    configs = [
        # tiny shapes (single head group, single tile)
        dict(B=2, N=8, C=32, num_heads=4, tile_n=None),
        # head_dim=64: exercises paired lane-dense head groups + multi-tile grid
        dict(B=1, N=32, C=256, num_heads=4, tile_n=16),
    ]
    for i, cfg in enumerate(configs):
        kx, kp, key = jax.random.split(key, 3)
        x = jax.random.normal(kx, (cfg["B"], cfg["N"], cfg["C"]), jnp.float32)
        params = init_params(kp, cfg["C"], cfg["num_heads"])
        out = jax.block_until_ready(
            vit_block_forward(x, params, num_heads=cfg["num_heads"],
                              tile_n=cfg["tile_n"]))
        ref = reference_block(x, params, cfg["num_heads"])
        assert out.shape == x.shape
        max_err = jnp.max(jnp.abs(out - ref))
        assert jnp.allclose(out, ref, atol=2e-2, rtol=2e-2), (
            f"config {i}: mismatch vs reference (max abs err {max_err})")

    print("KERNEL_OK")
</pallas_src>

<mosaic_0001>
module attributes {stable_mosaic.version = 11 : i64} {
  func.func @qkv_kernel(%arg0: i32, %arg1: i32, %arg2: memref<1x8x32xf32, #tpu.memory_space<vmem>>, %arg3: memref<1x32xf32, #tpu.memory_space<vmem>>, %arg4: memref<1x32xf32, #tpu.memory_space<vmem>>, %arg5: memref<32x96xbf16, #tpu.memory_space<vmem>>, %arg6: memref<1x8x32xbf16, #tpu.memory_space<vmem>>, %arg7: memref<1x8x32xbf16, #tpu.memory_space<vmem>>, %arg8: memref<1x8x32xbf16, #tpu.memory_space<vmem>>) attributes {dimension_semantics = [#tpu.dimension_semantics<parallel>, #tpu.dimension_semantics<parallel>], iteration_bounds = array<i64: 2, 1>, scalar_prefetch = 0 : i64, scratch_operands = 0 : i64, tpu.core_type = #tpu.core_type<tc>, window_params = [{transform_indices = @transform_0, window_bounds = array<i64: 1, 8, 32>}, {pipeline_mode = #tpu.pipeline_mode<synchronous>, transform_indices = @transform_1, window_bounds = array<i64: 1, 32>}, {pipeline_mode = #tpu.pipeline_mode<synchronous>, transform_indices = @transform_2, window_bounds = array<i64: 1, 32>}, {pipeline_mode = #tpu.pipeline_mode<synchronous>, transform_indices = @transform_3, window_bounds = array<i64: 32, 96>}, {transform_indices = @transform_4, window_bounds = array<i64: 1, 8, 32>}, {transform_indices = @transform_5, window_bounds = array<i64: 1, 8, 32>}, {transform_indices = @transform_6, window_bounds = array<i64: 1, 8, 32>}]} {
    %c0 = arith.constant 0 : index
    %c0_0 = arith.constant 0 : index
    %c0_1 = arith.constant 0 : index
    %0 = vector.load %arg2[%c0, %c0_0, %c0_1] : memref<1x8x32xf32, #tpu.memory_space<vmem>>, vector<1x8x32xf32>
    %1 = vector.shape_cast %0 : vector<1x8x32xf32> to vector<8x32xf32>
    %c0_2 = arith.constant 0 : index
    %c0_3 = arith.constant 0 : index
    %2 = vector.load %arg3[%c0_2, %c0_3] : memref<1x32xf32, #tpu.memory_space<vmem>>, vector<1x32xf32>
    %c0_4 = arith.constant 0 : index
    %c0_5 = arith.constant 0 : index
    %3 = vector.load %arg4[%c0_4, %c0_5] : memref<1x32xf32, #tpu.memory_space<vmem>>, vector<1x32xf32>
    %cst = arith.constant dense<0.000000e+00> : vector<8xf32>
    %4 = vector.multi_reduction <add>, %1, %cst [1] : vector<8x32xf32> to vector<8xf32>
    %5 = vector.shape_cast %4 : vector<8xf32> to vector<8x1xf32>
    %cst_6 = arith.constant 3.200000e+01 : f32
    %6 = vector.broadcast %cst_6 : f32 to vector<8x1xf32>
    %7 = arith.divf %5, %6 : vector<8x1xf32>
    %8 = vector.broadcast %7 : vector<8x1xf32> to vector<8x32xf32>
    %9 = arith.subf %1, %8 : vector<8x32xf32>
    %10 = arith.mulf %9, %9 : vector<8x32xf32>
    %cst_7 = arith.constant dense<0.000000e+00> : vector<8xf32>
    %11 = vector.multi_reduction <add>, %10, %cst_7 [1] : vector<8x32xf32> to vector<8xf32>
    %12 = vector.shape_cast %11 : vector<8xf32> to vector<8x1xf32>
    %cst_8 = arith.constant 3.200000e+01 : f32
    %13 = vector.broadcast %cst_8 : f32 to vector<8x1xf32>
    %14 = arith.divf %12, %13 : vector<8x1xf32>
    %15 = vector.broadcast %7 : vector<8x1xf32> to vector<8x32xf32>
    %16 = arith.subf %1, %15 : vector<8x32xf32>
    %cst_9 = arith.constant 9.99999974E-6 : f32
    %17 = vector.broadcast %cst_9 : f32 to vector<8x1xf32>
    %18 = arith.addf %14, %17 : vector<8x1xf32>
    %19 = math.rsqrt %18 : vector<8x1xf32>
    %20 = vector.broadcast %19 : vector<8x1xf32> to vector<8x32xf32>
    %21 = arith.mulf %16, %20 : vector<8x32xf32>
    %22 = vector.broadcast %2 : vector<1x32xf32> to vector<8x32xf32>
    %23 = arith.mulf %21, %22 : vector<8x32xf32>
    %24 = vector.broadcast %3 : vector<1x32xf32> to vector<8x32xf32>
    %25 = arith.addf %23, %24 : vector<8x32xf32>
    %26 = arith.truncf %25 : vector<8x32xf32> to vector<8x32xbf16>
    %c0_10 = arith.constant 0 : index
    %c0_11 = arith.constant 0 : index
    %27 = vector.load %arg5[%c0_10, %c0_11] : memref<32x96xbf16, #tpu.memory_space<vmem>>, vector<32x96xbf16>
    %cst_12 = arith.constant dense<0.000000e+00> : vector<8x96xf32>
    %28 = tpu.matmul %26, %27, %cst_12 {dimension_numbers = #tpu.dot_dimension_numbers<[1], [0], [0], [1], [0, 0, 1, 1], [], []>} : vector<8x32xbf16>, vector<32x96xbf16>, vector<8x96xf32> -> vector<8x96xf32>
    %29 = vector.extract_strided_slice %28 {offsets = [0, 0], sizes = [8, 32], strides = [1, 1]} : vector<8x96xf32> to vector<8x32xf32>
    %cst_13 = arith.constant 0.353553385 : f32
    %30 = vector.broadcast %cst_13 : f32 to vector<8x32xf32>
    %31 = arith.mulf %29, %30 : vector<8x32xf32>
    %32 = arith.truncf %31 : vector<8x32xf32> to vector<8x32xbf16>
    %c0_14 = arith.constant 0 : index
    %c0_15 = arith.constant 0 : index
    %c0_16 = arith.constant 0 : index
    %33 = vector.load %arg6[%c0_14, %c0_15, %c0_16] : memref<1x8x32xbf16, #tpu.memory_space<vmem>>, vector<1x8x32xbf16>
    %34 = vector.shape_cast %33 : vector<1x8x32xbf16> to vector<8x32xbf16>
    %35 = vector.shape_cast %32 : vector<8x32xbf16> to vector<1x8x32xbf16>
    tpu.vector_store %arg6[%c0_14, %c0_15, %c0_16], %35 {strides = array<i32>} : memref<1x8x32xbf16, #tpu.memory_space<vmem>>, vector<1x8x32xbf16>,
    %36 = vector.extract_strided_slice %28 {offsets = [0, 32], sizes = [8, 32], strides = [1, 1]} : vector<8x96xf32> to vector<8x32xf32>
    %37 = arith.truncf %36 : vector<8x32xf32> to vector<8x32xbf16>
    %c0_17 = arith.constant 0 : index
    %c0_18 = arith.constant 0 : index
    %c0_19 = arith.constant 0 : index
    %38 = vector.load %arg7[%c0_17, %c0_18, %c0_19] : memref<1x8x32xbf16, #tpu.memory_space<vmem>>, vector<1x8x32xbf16>
    %39 = vector.shape_cast %38 : vector<1x8x32xbf16> to vector<8x32xbf16>
    %40 = vector.shape_cast %37 : vector<8x32xbf16> to vector<1x8x32xbf16>
    tpu.vector_store %arg7[%c0_17, %c0_18, %c0_19], %40 {strides = array<i32>} : memref<1x8x32xbf16, #tpu.memory_space<vmem>>, vector<1x8x32xbf16>,
    %41 = vector.extract_strided_slice %28 {offsets = [0, 64], sizes = [8, 32], strides = [1, 1]} : vector<8x96xf32> to vector<8x32xf32>
    %42 = arith.truncf %41 : vector<8x32xf32> to vector<8x32xbf16>
    %c0_20 = arith.constant 0 : index
    %c0_21 = arith.constant 0 : index
    %c0_22 = arith.constant 0 : index
    %43 = vector.load %arg8[%c0_20, %c0_21, %c0_22] : memref<1x8x32xbf16, #tpu.memory_space<vmem>>, vector<1x8x32xbf16>
    %44 = vector.shape_cast %43 : vector<1x8x32xbf16> to vector<8x32xbf16>
    %45 = vector.shape_cast %42 : vector<8x32xbf16> to vector<1x8x32xbf16>
    tpu.vector_store %arg8[%c0_20, %c0_21, %c0_22], %45 {strides = array<i32>} : memref<1x8x32xbf16, #tpu.memory_space<vmem>>, vector<1x8x32xbf16>,
    return
  }
  func.func @transform_0(%arg0: i32, %arg1: i32) -> (i32, i32, i32) {
    %c0_i32 = arith.constant 0 : i32
    %c0_i32_0 = arith.constant 0 : i32
    return %arg0, %arg1, %c0_i32 : i32, i32, i32
  }
  func.func @transform_1(%arg0: i32, %arg1: i32) -> (i32, i32) {
    %c0_i32 = arith.constant 0 : i32
    %c0_i32_0 = arith.constant 0 : i32
    %c0_i32_1 = arith.constant 0 : i32
    return %c0_i32, %c0_i32_0 : i32, i32
  }
  func.func @transform_2(%arg0: i32, %arg1: i32) -> (i32, i32) {
    %c0_i32 = arith.constant 0 : i32
    %c0_i32_0 = arith.constant 0 : i32
    %c0_i32_1 = arith.constant 0 : i32
    return %c0_i32, %c0_i32_0 : i32, i32
  }
  func.func @transform_3(%arg0: i32, %arg1: i32) -> (i32, i32) {
    %c0_i32 = arith.constant 0 : i32
    %c0_i32_0 = arith.constant 0 : i32
    %c0_i32_1 = arith.constant 0 : i32
    return %c0_i32, %c0_i32_0 : i32, i32
  }
  func.func @transform_4(%arg0: i32, %arg1: i32) -> (i32, i32, i32) {
    %c0_i32 = arith.constant 0 : i32
    %c0_i32_0 = arith.constant 0 : i32
    return %arg0, %arg1, %c0_i32 : i32, i32, i32
  }
  func.func @transform_5(%arg0: i32, %arg1: i32) -> (i32, i32, i32) {
    %c0_i32 = arith.constant 0 : i32
    %c0_i32_0 = arith.constant 0 : i32
    return %arg0, %arg1, %c0_i32 : i32, i32, i32
  }
  func.func @transform_6(%arg0: i32, %arg1: i32) -> (i32, i32, i32) {
    %c0_i32 = arith.constant 0 : i32
    %c0_i32_0 = arith.constant 0 : i32
    return %arg0, %arg1, %c0_i32 : i32, i32, i32
  }
}

</mosaic_0001>

<bundles_post_ra>
// kernel: tpu_custom_call.1
= control target key start
LH: loop header
LB: loop body
LE: loop exit
PB: predicated region body
PF: predicated region fallthrough
CT: control target
= control target key end

     0   :  { %s1263_s0 = inlined_call_operand.hbm [shape: f32[2,8,32], index: 0, kind: input, shape index: {}]   ;;  %s1264_s1 = inlined_call_operand.vmem [shape: f32[1,32], index: 1, kind: input, shape index: {}]   ;;  %s1265_s2 = inlined_call_operand.vmem [shape: f32[1,32], index: 2, kind: input, shape index: {}]   ;;  %s1266_s3 = inlined_call_operand.hbm [shape: bf16[32,96], index: 3, kind: input, shape index: {}]   ;;  %s1267_s4 = inlined_call_operand.hbm [shape: bf16[2,8,32], index: 4, kind: output, shape index: {0}]   ;;  %s1268_s5 = inlined_call_operand.hbm [shape: bf16[2,8,32], index: 5, kind: output, shape index: {1}]   ;;  %s1269_s6 = inlined_call_operand.hbm [shape: bf16[2,8,32], index: 6, kind: output, shape index: {2}]  }
   0x1   :  { %1274 = sst [smem:[#allocation17_spill]] %s1266_s3 }
   0x2   :  { %12 = vsyncpa [#allocation3], 0 }
   0x3   :  { %14 = vsyncpa [#allocation3 + $0x1], 0 }
   0x4   :  { %15 = vsyncpa [#allocation6], 0 }
   0x5   :  { %16 = vsyncpa [#allocation4], 0 }
   0x6   :  { %18 = vsyncpa [#allocation4 + $0x1], 0 }
   0x7   :  { %19 = vsyncpa [#allocation9], 0 }
   0x8   :  { %21 = vsyncpa [#allocation9 + $0x1], 0  ;;  %s1010_s21 = smov 0   ;;  %s1012_s22 = smov 0  }
   0x9   :  { %s1014_s23 = smov 0   ;;  %s1016_s24 = smov 0  }
   0xa   :  { %s1018_s25 = smov 0   ;;  %s1020_s26 = smov 0  }
   0xb LB: > { %1275 = sst [smem:[#allocation15_spill]] %s958_s25  ;;  %s1041_s27 = sadd.s32 4294967295, %s962_s26   ;;  %s962_s26 = sphi %s1020_s26, %s27_s26   ;;  %s958_s25 = sphi %s1018_s25, %s1292_s25   ;;  %s954_s24 = sphi %s1016_s24, %s1291_s24   ;;  %s950_s23 = sphi %s1014_s23, %s1295_s23   ;;  %s946_s22 = sphi %s1012_s22, %s1294_s22   ;;  %s942_s21 = sphi %s1010_s21, %s1293_s21  }
   0xc   : > { %s1270_s28 = sadd.s32 4294967294, %s962_s26   ;;  %p61_p0 = scmp.ne.s32.totalorder %s946_s22, %s942_s21 }
   0xd   : > { %p1273_p1 = scmp.eq.s32.totalorder %s1041_s27, 0  ;;  %p156_p3 = scmp.eq.s32.totalorder %s1270_s28, 1 }
   0xe   : > { %p638_p5 = scmp.ge.s32.totalorder %s962_s26, 1  ;;  %p219_p7 = scmp.lt.s32.totalorder %s962_s26, 3 }
   0xf   : > { %p1052_p4 = por %p1273_p1, %p61_p0  ;;  %p1057_p6 = por %p156_p3, %p61_p0 }
  0x10   : > { %p1062_p8 = pnand %p638_p5, %p219_p7  ;;  %s964_s8 = smov [#allocation5]  }
  0x11   : > { %s1277_s30 = scalar_select %p1057_p6, 1, 0 }
  0x12   : > { %s237_s9 = sshll.u32 %s964_s8, 4  ;;  %p687_p9 = pneg %p1062_p8  ;;  %s238_s9 = int_to_ptr.vmem [resolvable:$true] %s237_s9 }
  0x13   : > { %s39_s11 = sadd.s32 1, %s958_s25  ;;  %s779_s12 = scalar_lea.vmem %s238_s9, 256 }
  0x14   : > { %p1071_p11 = pnand %p687_p9, %p1273_p1  ;;  %p780_p13 = scmp.ne.s32.totalorder %s238_s9, %s779_s12 }
  0x15   : > { %p787_p5 = scmp.lt.s32.totalorder %s238_s9, %s238_s9  ;;  %p788_p7 = scmp.lt.s32.totalorder %s779_s12, %s779_s12 }
  0x16   : > { %p770_p12 = pneg %p1071_p11 }
  0x17   : > { %p789_p2 = por %p788_p7, %p787_p5 }
  0x18   : > { %p782_p0 = pnand %p780_p13, %p770_p12 }
  0x1a   : > { %p783_p3 = pneg %p782_p0 }
  0x1c   : > { %p790_p6 = pnand %p789_p2, %p783_p3 }
  0x1e   : > { %793 = shalt.err (!%p790_p6)
}
  0x1f   : > { %s965_s13 = smov 64   ;;  %s966_s14 = smov 4  }
  0x20   : > { %s1280_s3 = sld [smem:[#allocation17_spill]]  ;;  %p41_p2 = scmp.ge.s32.totalorder %s39_s11, 2 }
  0x21   : > { %s48_s17 = sadd.s32 1, %s950_s23  ;;  %p55_p6 = scmp.ne.s32.totalorder %s950_s23, %s946_s22 }
  0x22   : > { %p56_p9 = scmp.eq.s32.totalorder %s962_s26, 0  ;;  %s1297_s11 = smov (%p41_p2, %s39_s11), 0 }
  0x23   : > { %1281 = sst [smem:[#allocation16_spill]] %s1297_s11  ;;  %p1283_p13 = scmp.eq.s32.totalorder %s1041_s27, 1 }
  0x24   : > { %p1089_p12 = por %p56_p9, %p55_p6  ;;  %s43_s20 = ssub.s32 %s958_s25, %s1297_s11 }
  0x25   : > { %p1095_p0 = por %p1283_p13, %p55_p6  ;;  %p706_p3 = scmp.lt.s32.totalorder %s962_s26, 2 }
  0x26   : > { %690 = dma.hbm_to_vmem [thread:$0]  (!%p1071_p11), %s1280_s3, 256, %s238_s9, [#allocation6], %s965_s13, %s965_s13, %s966_s14  }
  0x27   : > { %p46_p11 = scmp.eq.s32.totalorder %s43_s20, 0  ;;  %s251_s8 = sand.u32 1, %s950_s23  }
  0x28   : > { %s641_s9 = sshll.u32 %s251_s8, 3  ;;  %s642_s12 = sshll.u32 %s958_s25, 7 }
  0x29   : > { %s1104_s10 = scalar_select %p46_p11, %s950_s23, %s48_s17  }
  0x2a   : > { %s261_s15 = scalar_lea.hbm %s1263_s0, %s642_s12  ;;  %s255_s16 = scalar_lea.vmem [#allocation2], %s641_s9 }
  0x2b   : > { %s263_s28 = sshll.u32 %s255_s16, 4  ;;  %p1112_p5 = pnand %p706_p3, %p1089_p12  ;;  %s264_s28 = int_to_ptr.vmem [resolvable:$true] %s263_s28 }
  0x2c   : > { %s252_s11 = scalar_lea.sflag [#allocation3], %s251_s8  ;;  %s807_s20 = scalar_lea.vmem %s264_s28, 128 }
  0x2d   : > { %p796_p7 = pneg %p1112_p5  ;;  %p808_p2 = scmp.ne.s32.totalorder %s264_s28, %s807_s20 }
  0x2e   : > { %s967_s17 = smov [#allocation2]  }
  0x2f   : > { %p810_p6 = pnand %p808_p2, %p796_p7  ;;  %s812_s25 = sshll.u32 %s967_s17, 4  ;;  %s813_s25 = int_to_ptr.vmem [resolvable:$false] %s812_s25 }
  0x30   : > { %s814_s12 = scalar_lea.vmem %s813_s25, 256  ;;  %p815_p13 = scmp.lt.s32.totalorder %s264_s28, %s813_s25 }
  0x31   : > { %p811_p9 = pneg %p810_p6  ;;  %p816_p11 = scmp.lt.s32.totalorder %s814_s12, %s807_s20 }
  0x33   : > { %p817_p10 = por %p816_p11, %p815_p13 }
  0x35   : > { %p818_p1 = pnand %p817_p10, %p811_p9 }
  0x37   : > { %821 = shalt.err (!%p818_p1)
}
  0x38   : > { %694 = dma.hbm_to_vmem [thread:$0]  (!%p1112_p5), %s261_s15, 128, %s264_s28, %s252_s11  }
  0x39   : > { %272 = sbr.rel (%p1062_p8) target bundleno = 722 (0x2d2), region = 36  ;;  %s1123_s18 = sand.u32 (!%p1062_p8), 1, %s946_s22  }
  0x3a   : > { %s644_s8 = sshll.u32 (!%p1062_p8), %s1123_s18, 3  ;;  %s275_s9 = scalar_lea.sflag (!%p1062_p8), [#allocation3], %s1123_s18 }
  0x3b   : > { %s278_s13 = scalar_lea.vmem (!%p1062_p8), [#allocation2], %s644_s8 }
  0x3e   : > { %925 = dma.done.wait (%p1052_p4), %s275_s9, 128  }
  0x3f   : > { %927 = vsyncadd (%p1052_p4), %s275_s9, 4294967168  ;;  %p1286_p1 = scmp.eq.s32.totalorder %s1041_s27, 0 }
  0x41   : > { %929 = dma.done.wait (%p1286_p1), [#allocation6], 256   ;;  %p1287_p10 = pmov %p1286_p1 }
  0x42   : > { %vm325_vm0 = vcmask 261120   ;;  %v322_v0 = vld [vmem:[%s278_s13] sm:$0xff]  ;;  %v764_v7 = vld [vmem:[#allocation5 + $0x8] sm:$0xff]   ;;  %v968_v8 = vmov 0.0   ;;  %vm969_vm1 = vmmov 0   ;;  %v765_v9 = vld [vmem:[#allocation5] sm:$0xff]  }
  0x43   : > { %931 = vsyncadd (%p1287_p10), [#allocation6], 4294967040  ;;  %v326_v1 = vsel %vm325_vm0, %v322_v0, 0.0  ;;  %667 = vmatprep.subr.bf16.mxu0 %v968_v8  ;;  %671 = vmatprep.mubr.msk.bf16.mxu0 %vm969_vm1, %v968_v8  ;;  %v649_v14 = vld [vmem:[%s1264_s1] ss:$0 sm:$0xff]  ;;  %s1145_s7 = sshll.u32 %s1123_s18, 2 }
  0x44   : > { %327 = vadd.xlane.f32.xlu0 %v326_v1  ;;  %668 = vmatpush3.bf16.msra.mxu0 %v764_v7  ;;  %v650_v16 = vld [vmem:[%s1265_s2] ss:$0 sm:$0xff]  ;;  %s1148_s11 = sshll.u32 %s954_s24, 6  ;;  %s306_s14 = scalar_lea.vmem [#allocation7], %s1145_s7  ;;  %vm416_vm2 = vcmask 257024  }
  0x45   : > { %669 = vmatprep.subr.bf16.mxu0 %v968_v8  ;;  %s455_s15 = sshll.u32 %s306_s14, 4  ;;  %s970_s16 = smov 96   ;;  %s1157_s15 = int_to_ptr.vmem [resolvable:$true] %s455_s15 }
  0x46   : > { %s1155_s12 = scalar_lea.hbm %s1267_s4, %s1148_s11  ;;  %s431_s24 = scalar_lea.sflag [#allocation4], %s1123_s18 }
  0x47   : > { %s822_s8 = scalar_lea.vmem %s1157_s15, 64  ;;  %s971_s9 = smov [#allocation7]  }
  0x48   : > { %670 = vmatpush3.bf16.msra.mxu0 %v765_v9  ;;  %p823_p4 = scmp.ne.s32.totalorder %s1157_s15, %s822_s8  ;;  %s826_s13 = sshll.u32 %s971_s9, 4  ;;  %s827_s13 = int_to_ptr.vmem [resolvable:$false] %s826_s13 }
  0x49   : > { %s828_s3 = scalar_lea.vmem %s827_s13, 128  ;;  %p829_p3 = scmp.lt.s32.totalorder %s1157_s15, %s827_s13 }
  0x4a   : > { %p824_p8 = pnand %p823_p4, %p1095_p0  ;;  %p830_p5 = scmp.lt.s32.totalorder %s828_s3, %s822_s8 }
  0x4c   : > { %p825_p12 = pneg %p824_p8  ;;  %p831_p7 = por %p830_p5, %p829_p3 }
  0x4e   : > { %p832_p2 = pnand %p831_p7, %p825_p12 }
  0xcd   : > { %v328_v2 = vpop.xlane.xlu0 %327 }
  0xce   : > { %v330_v3 = vmul.f32 0.03125, %v328_v2 }
  0xd0   : > { %v331_v4 = vsub.f32 %v322_v0, %v330_v3 }
  0xd2   : > { %v332_v5 = vmul.f32 %v331_v4, %v331_v4 }
  0xd4   : > { %v333_v6 = vsel %vm325_vm0, %v332_v5, 0.0 }
  0xd5   : > { %334 = vadd.xlane.f32.xlu0 %v333_v6 }
 0x15e   : > { %v335_v10 = vpop.xlane.xlu0 %334 }
 0x15f   : > { %v336_v11 = vmul.f32 0.03125, %v335_v10 }
 0x161   : > { %v337_v12 = vadd.f32 1e-05, %v336_v11 }
 0x163   : > { %766 = vrsqrt.f32 %v337_v12 }
 0x170   : > { %v767_v13 = vpop.eup %766 }
 0x171   : > { %v339_v15 = vmul.f32 %v767_v13, %v331_v4 }
 0x173   : > { %v346_v17 = vmul.f32 %v649_v14, %v339_v15 }
 0x175   : > { %v353_v18 = vadd.f32 %v650_v16, %v346_v17 }
 0x177   : > { %v354_v19 = vpack.c.bf16 %v353_v18, %v353_v18 }
 0x179   : > { %672 = vmatmul.mubr.msk.bf16.vlgmr.msra.gmra.mxu0 %vm325_vm0, %v354_v19 }
 0x239   : > { %v408_v20 = vpop.f32.mrf.mxu0 }
 0x23a   : > { %v414_v21 = vmul.f32 0.35355338, %v408_v20  ;;  %v663_v22 = vpack.c.bf16 %v408_v20, %v408_v20 }
 0x23b   : > { %v673_v23 = vpop.f32.mrf.mxu0 }
 0x23c   : > { %v415_v24 = vpack.c.bf16 %v414_v21, %v414_v21  ;;  %422 = vrot.lane.b32.xlu1 %v663_v22, %s970_s16 }
 0x23d   : > { %v411_v25 = vpop.f32.mrf.mxu0 }
 0x23e   : > { %417 = vst.msk [vmem:[%s306_s14] sm:$0xf] %vm416_vm2, %v415_v24 }
 0x23f   : > { %v674_v26 = vpop.f32.mrf.mxu0 }
 0x240   : > { %835 = shalt.err (!%p832_p2)
}
 0x241   : > { %s836_s25 = scalar_lea.hbm %s1155_s12, 64  ;;  %s840_s29 = scalar_lea.hbm %s1267_s4, 128 }
 0x242   : > { %p837_p6 = scmp.ne.s32.totalorder %s1155_s12, %s836_s25  ;;  %p841_p11 = scmp.lt.s32.totalorder %s1155_s12, %s1267_s4 }
 0x243   : > { %p842_p1 = scmp.lt.s32.totalorder %s840_s29, %s836_s25 }
 0x244   : > { %p838_p9 = pnand %p837_p6, %p1095_p0 }
 0x245   : > { %p843_p10 = por %p842_p1, %p841_p11 }
 0x246   : > { %p839_p13 = pneg %p838_p9 }
 0x248   : > { %p844_p4 = pnand %p843_p10, %p839_p13 }
 0x24a   : > { %847 = shalt.err (!%p844_p4)
}
 0x24b   : > { %681 = dma.vmem_to_hbm [thread:$0]  (%p1095_p0), %s1157_s15, 64, %s1155_s12, %s431_s24  }
 0x24c   : > { %s972_s20 = smov 64   ;;  %s435_s17 = sand.u32 1, %s1041_s27  }
 0x24d   : > { %426 = vrot.lane.b32.xlu1 %v663_v22, %s972_s20  ;;  %s313_s8 = scalar_lea.vmem [#allocation8], %s1145_s7  ;;  %s1187_s25 = scalar_lea.hbm %s1268_s5, %s1148_s11 }
 0x24e   : > { %s469_s9 = sshll.u32 %s313_s8, 4  ;;  %s320_s18 = scalar_lea.vmem [#allocation10], %s1145_s7  ;;  %s1189_s9 = int_to_ptr.vmem [resolvable:$true] %s469_s9 }
 0x24f   : > { %s483_s28 = sshll.u32 %s320_s18, 4  ;;  %s1195_s15 = scalar_lea.sflag [#allocation9], %s435_s17  ;;  %s484_s28 = int_to_ptr.vmem [resolvable:$true] %s483_s28 }
 0x250   : > { %s848_s27 = scalar_lea.vmem %s1189_s9, 64  ;;  %s973_s12 = smov [#allocation8]  }
 0x251   : > { %p849_p8 = scmp.ne.s32.totalorder %s1189_s9, %s848_s27  ;;  %s852_s24 = sshll.u32 %s973_s12, 4  ;;  %s853_s24 = int_to_ptr.vmem [resolvable:$false] %s852_s24 }
 0x252   : > { %s854_s29 = scalar_lea.vmem %s853_s24, 128  ;;  %p855_p5 = scmp.lt.s32.totalorder %s1189_s9, %s853_s24 }
 0x253   : > { %p850_p12 = pnand %p849_p8, %p1095_p0  ;;  %p856_p7 = scmp.lt.s32.totalorder %s854_s29, %s848_s27 }
 0x255   : > { %p851_p3 = pneg %p850_p12  ;;  %p857_p2 = por %p856_p7, %p855_p5 }
 0x257   : > { %p858_p6 = pnand %p857_p2, %p851_p3 }
 0x2ae   : > { %v423_v27 = vpop.permute.xlu1 %422 }
 0x2af   : > { %425 = vst.msk [vmem:[%s313_s8] sm:$0xf] %vm416_vm2, %v423_v27 }
 0x2b0   : > { %861 = shalt.err (!%p858_p6)
}
 0x2b1   : > { %s862_s14 = scalar_lea.hbm %s1187_s25, 64  ;;  %s866_s17 = scalar_lea.hbm %s1268_s5, 128 }
 0x2b2   : > { %p863_p9 = scmp.ne.s32.totalorder %s1187_s25, %s862_s14  ;;  %p867_p1 = scmp.lt.s32.totalorder %s1187_s25, %s1268_s5 }
 0x2b3   : > { %p868_p10 = scmp.lt.s32.totalorder %s866_s17, %s862_s14 }
 0x2b4   : > { %p864_p13 = pnand %p863_p9, %p1095_p0 }
 0x2b5   : > { %p869_p4 = por %p868_p10, %p867_p1 }
 0x2b6   : > { %p865_p11 = pneg %p864_p13 }
 0x2b8   : > { %p870_p8 = pnand %p869_p4, %p865_p11 }
 0x2ba   : > { %873 = shalt.err (!%p870_p8)
}
 0x2bb   : > { %682 = dma.vmem_to_hbm [thread:$0]  (%p1095_p0), %s1189_s9, 64, %s1187_s25, %s1195_s15  }
 0x2bc   : > { %s481_s12 = scalar_lea.hbm %s1269_s6, %s1148_s11  ;;  %s874_s24 = scalar_lea.vmem %s484_s28, 64 }
 0x2bd   : > { %p875_p12 = scmp.ne.s32.totalorder %s484_s28, %s874_s24  ;;  %s974_s29 = smov [#allocation10]  }
 0x2be   : > { %s878_s14 = sshll.u32 %s974_s29, 4  ;;  %s879_s14 = int_to_ptr.vmem [resolvable:$false] %s878_s14 }
 0x2bf   : > { %v427_v28 = vpop.permute.xlu1 %426  ;;  %p876_p3 = pnand %p875_p12, %p1095_p0  ;;  %s880_s16 = scalar_lea.vmem %s879_s14, 128 }
 0x2c0   : > { %429 = vst.msk [vmem:[%s320_s18] sm:$0xf] %vm416_vm2, %v427_v28  ;;  %p881_p7 = scmp.lt.s32.totalorder %s484_s28, %s879_s14  ;;  %p882_p2 = scmp.lt.s32.totalorder %s880_s16, %s874_s24 }
 0x2c1   : > { %p877_p5 = pneg %p876_p3 }
 0x2c2   : > { %p883_p6 = por %p882_p2, %p881_p7 }
 0x2c4   : > { %p884_p9 = pnand %p883_p6, %p877_p5 }
 0x2c6   : > { %887 = shalt.err (!%p884_p9)
}
 0x2c7   : > { %s888_s11 = scalar_lea.hbm %s481_s12, 64  ;;  %s892_s25 = scalar_lea.hbm %s1269_s6, 128 }
 0x2c8   : > { %p889_p13 = scmp.ne.s32.totalorder %s481_s12, %s888_s11  ;;  %p893_p10 = scmp.lt.s32.totalorder %s481_s12, %s1269_s6 }
 0x2c9   : > { %p894_p4 = scmp.lt.s32.totalorder %s892_s25, %s888_s11 }
 0x2ca   : > { %p890_p11 = pnand %p889_p13, %p1095_p0 }
 0x2cb   : > { %p895_p8 = por %p894_p4, %p893_p10 }
 0x2cc   : > { %p891_p1 = pneg %p890_p11 }
 0x2ce   : > { %p896_p12 = pnand %p895_p8, %p891_p1 }
 0x2d0   : > { %899 = shalt.err (!%p896_p12)
}
 0x2d1   : > { %683 = dma.vmem_to_hbm [thread:$0]  (%p1095_p0), %s484_s28, 64, %s481_s12, %s1195_s15  }
 0x2d2 PF: > { %s495_s17 = sand.u32 1, %s942_s21   ;;  %p1288_p3 = scmp.ne.s32.totalorder %s1277_s30, 0 }
 0x2d3   : > { %p1289_p5 = scmp.ge.s32.totalorder %s962_s26, 2  ;;  %s496_s8 = scalar_lea.sflag [#allocation4], %s495_s17 }
 0x2d5   : > { %p696_p7 = pnand %p1289_p5, %p1288_p3 }
 0x2d7   : > { %p697_p2 = pneg %p696_p7 }
 0x2d9   : > { %933 = dma.done.wait (%p697_p2), %s496_s8, 64  }
 0x2da   : > { %935 = vsyncadd (%p697_p2), %s496_s8, 4294967232  ;;  %s1290_s13 = sadd.s32 4294967294, %s962_s26  }
 0x2db   : > { %s504_s3 = sand.u32 1, %s1290_s13  }
 0x2dc   : > { %s505_s27 = scalar_lea.sflag [#allocation9], %s504_s3 }
 0x2dd   : > { %937 = dma.done.wait (%p697_p2), %s505_s27, 128  }
 0x2de   : > { %939 = vsyncadd (%p697_p2), %s505_s27, 4294967168  ;;  %s27_s26 = sadd.s32 1, %s962_s26   ;;  %s1291_s24 = sld [smem:[#allocation15_spill]] }
 0x2df   : > { %p24_p0 = scmp.ge.s32.totalorder %s27_s26, 4   ;;  %s1292_s25 = sld [smem:[#allocation16_spill]] }
 0x2e0   : > { %s1293_s21 = smov %s946_s22  ;;  %s1294_s22 = smov %s950_s23 }
 0x2e1   : > { %s1295_s23 = smov %s1104_s10  ;;  %26 = sbr.rel (!%p24_p0) target bundleno = 11 (0xb), region = 117 }
 0x2e6   :  { %519 = vsyncpa [#allocation3], 1 }
 0x2e7   :  { %521 = vsyncpa [#allocation3 + $0x1], 1 }
 0x2e8   :  { %522 = vsyncpa [#allocation6], 1 }
 0x2e9   :  { %523 = vsyncpa [#allocation4], 1 }
 0x2ea   :  { %525 = vsyncpa [#allocation4 + $0x1], 1 }
 0x2eb   :  { %526 = vsyncpa [#allocation9], 1 }
 0x2ec   :  { %528 = vsyncpa [#allocation9 + $0x1], 1 }

</bundles_post_ra>
